<compile_context>
chip_gen: v6e
topology: v6e:2x2x1
jax: 0.10.0
libtpu: 0.0.40
codegen_flags: <defaults>
</compile_context>

<pallas_src>
import math

import jax
import jax.numpy as jnp
from jax.experimental import pallas as pl
from jax.experimental.pallas import tpu as pltpu

MODEL_CHANNELS = 32          # model_channels
NUM_CAMERAS = 4              # num_cameras
NUM_HEADS = 8                # nn.MultiheadAttention num_heads
HEAD_DIM = MODEL_CHANNELS // NUM_HEADS
LN_EPS = 1e-5                # PyTorch LayerNorm default
BATCH = 4                    # camera sets processed per pallas_call (amortizes launch+DMA)

C = MODEL_CHANNELS
C2 = C // 2                  # 16
N = NUM_CAMERAS              # 4
H = NUM_HEADS                # 8
D = HEAD_DIM                 # 4
NH = N * H                   # 32 folded rows per camera set (head-major)
BN = BATCH * N               # 16 total camera rows
BNH = BATCH * NH             # 128 total folded rows
assert BNH <= 128            # block-diagonal score bias must fit one lane tile

# ---- packed parameter slab layout: (SLAB_ROWS, 128) f32, every block 8-row aligned ----
ROW_W1 = 0                   # (16, 16)
ROW_W2QKV = 16               # (16, 96)   w2 @ [wq/sqrt(D) | wk | wv]
ROW_WO = 32                  # (32, 32)
ROW_WP1 = 64                 # (32, 32)
ROW_WP2 = 96                 # (32, 32)
ROW_BIAS = 128               # (8, 128)   one tile: b1, b2qkv, bo, ln_g, ln_b, bp1, bp2
ROW_REP = 136                # (BNH, BN)  0/1 replication matrix
ROW_HMASK = ROW_REP + BNH    # (BNH, C)   0/1 per-head channel mask
ROW_BLK = ROW_HMASK + BNH    # (BNH, BNH) 0 / -1e30 additive score bias
ROW_POOL = ROW_BLK + BNH     # (BATCH, BNH) 0 / (1/N) pooling matrix
SLAB_ROWS = ROW_POOL + 8     # 528 (multiple of 8)
SLAB_COLS = 128
assert SLAB_ROWS % 8 == 0


def _silu(x):
    # x * sigmoid(x), exact divide (ample VALU/EUP slack; parity with PyTorch).
    return x / (1.0 + jnp.exp(-x))


def _kernel(ext_ref, p_ref, out_ref):
    ext = ext_ref[...]                                               # (BN, 16)

    # ---- static (zero-cost) views into the single packed-parameter slab ----
    w1 = p_ref[ROW_W1:ROW_W1 + C2, 0:C2]
    w2qkv = p_ref[ROW_W2QKV:ROW_W2QKV + C2, 0:3 * C]
    wo = p_ref[ROW_WO:ROW_WO + C, 0:C]
    wp1 = p_ref[ROW_WP1:ROW_WP1 + C, 0:C]
    wp2 = p_ref[ROW_WP2:ROW_WP2 + C, 0:C]

    bias_tile = p_ref[ROW_BIAS:ROW_BIAS + 8, :]                      # one aligned (8,128) load
    b1 = bias_tile[0:1, 0:C2]
    b2qkv = bias_tile[1:2, 0:3 * C]
    bo = bias_tile[2:3, 0:C]
    ln_g = bias_tile[3:4, 0:C]
    ln_b = bias_tile[4:5, 0:C]
    bp1 = bias_tile[5:6, 0:C]
    bp2 = bias_tile[6:7, 0:C]

    rep = p_ref[ROW_REP:ROW_REP + BNH, 0:BN]                         # baked 0/1
    head_mask = p_ref[ROW_HMASK:ROW_HMASK + BNH, 0:C]                # baked 0/1
    blk_bias = p_ref[ROW_BLK:ROW_BLK + BNH, 0:BNH]                   # baked 0 / -1e30
    pool = p_ref[ROW_POOL:ROW_POOL + BATCH, 0:BNH]                   # baked 0 / (1/N)

    # ---- camera_embedder (second Linear folded into the fused QKV projection) ----
    hidden = _silu(jnp.dot(ext, w1, preferred_element_type=jnp.float32) + b1)     # (BN, 16)
    qkv = jnp.dot(hidden, w2qkv, preferred_element_type=jnp.float32) + b2qkv      # (BN, 3C)

    # ---- camera_fusion: all batches x heads at once (block-diagonal attention) ----
    g = jnp.dot(rep, qkv, preferred_element_type=jnp.float32)                     # (BNH, 3C)
    q_rep = g[:, 0:C]                       # deliberately unmasked (see invariant in header)
    k_msk = head_mask * g[:, C:2 * C]
    v_msk = head_mask * g[:, 2 * C:3 * C]

    # q @ k^T (dot_general proven to lower; pl.dot(trans_b=True) is the v6e alternative
    # if the compiler were to insert a vxpose here).
    s = jax.lax.dot_general(q_rep, k_msk, (((1,), (1,)), ((), ())),
                            preferred_element_type=jnp.float32)                   # (BNH, BNH)
    s = s + blk_bias                        # additive block-diagonal mask (keep!)
    s = s - jnp.max(s, axis=-1, keepdims=True)
    p = jnp.exp(s)
    p = p / jnp.sum(p, axis=-1, keepdims=True)
    o_big = jnp.dot(p, v_msk, preferred_element_type=jnp.float32)                 # (BNH, C)

    # ---- mean over cameras commutes with the linear collapse: one pooling matmul ----
    fused = jnp.dot(pool, o_big, preferred_element_type=jnp.float32)              # (B, C)
    fused = jnp.dot(fused, wo, preferred_element_type=jnp.float32) + bo           # (B, C)

    # ---- projector: LayerNorm -> Linear -> SiLU -> Linear ----
    mu = jnp.mean(fused, axis=-1, keepdims=True)
    var = jnp.mean((fused - mu) ** 2, axis=-1, keepdims=True)
    y = (fused - mu) * jax.lax.rsqrt(var + LN_EPS) * ln_g + ln_b
    y = _silu(jnp.dot(y, wp1, preferred_element_type=jnp.float32) + bp1)
    out_ref[...] = (jnp.dot(y, wp2, preferred_element_type=jnp.float32)
                    + bp2).astype(out_ref.dtype)


@jax.jit
def camera_conditioned_flow(ext, packed_params):
    """ext: (BATCH*NUM_CAMERAS, 16) flattened extrinsics (BATCH independent camera sets);
    packed_params: (528, 128) f32 slab.  Returns (BATCH, MODEL_CHANNELS)."""
    return pl.pallas_call(
        _kernel,
        out_shape=jax.ShapeDtypeStruct((BATCH, MODEL_CHANNELS), jnp.float32),
        in_specs=[pl.BlockSpec(memory_space=pltpu.MemorySpace.VMEM),
                  pl.BlockSpec(memory_space=pltpu.MemorySpace.VMEM)],
        out_specs=pl.BlockSpec(memory_space=pltpu.MemorySpace.VMEM),
    )(ext, packed_params)


def pack_params(params):
    """Host-side, one-time: fuse QKV (pre-scaled), fold w2 into it, bake all masks,
    and pack everything into one f32 slab."""
    scale = 1.0 / math.sqrt(HEAD_DIM)
    wqkv = jnp.concatenate([params["wq"] * scale, params["wk"], params["wv"]], axis=1)
    bqkv = jnp.concatenate([params["bq"] * scale, params["bk"], params["bv"]], axis=1)
    w2qkv = params["w2"] @ wqkv                              # (C2, 3C)
    b2qkv = params["b2"] @ wqkv + bqkv                       # (1, 3C)

    # Baked constants.  Row r = b*NH + h*N + i (batch, head, camera); column j = b*N + i.
    r = jnp.arange(BNH)
    j = jnp.arange(BN)
    c = jnp.arange(C)
    rep = ((r[:, None] // NH == j[None, :] // N)
           & (r[:, None] % N == j[None, :] % N)).astype(jnp.float32)              # (BNH, BN)
    head_mask = ((r[:, None] % NH) // N == c[None, :] // D).astype(jnp.float32)   # (BNH, C)
    blk_bias = jnp.where(r[:, None] // N == r[None, :] // N,
                         0.0, -1e30).astype(jnp.float32)                          # (BNH, BNH)
    pool = jnp.where(jnp.arange(BATCH)[:, None] == r[None, :] // NH,
                     1.0 / N, 0.0).astype(jnp.float32)                            # (B, BNH)

    slab = jnp.zeros((SLAB_ROWS, SLAB_COLS), jnp.float32)

    def put(s, row, a):
        a = jnp.asarray(a, jnp.float32)
        return s.at[row:row + a.shape[0], 0:a.shape[1]].set(a)

    slab = put(slab, ROW_W1, params["w1"])
    slab = put(slab, ROW_W2QKV, w2qkv)
    slab = put(slab, ROW_WO, params["wo"])
    slab = put(slab, ROW_WP1, params["wp1"])
    slab = put(slab, ROW_WP2, params["wp2"])
    slab = put(slab, ROW_BIAS + 0, params["b1"])
    slab = put(slab, ROW_BIAS + 1, b2qkv)
    slab = put(slab, ROW_BIAS + 2, params["bo"])
    slab = put(slab, ROW_BIAS + 3, params["ln_g"])
    slab = put(slab, ROW_BIAS + 4, params["ln_b"])
    slab = put(slab, ROW_BIAS + 5, params["bp1"])
    slab = put(slab, ROW_BIAS + 6, params["bp2"])
    slab = put(slab, ROW_REP, rep)
    slab = put(slab, ROW_HMASK, head_mask)
    slab = put(slab, ROW_BLK, blk_bias)
    slab = put(slab, ROW_POOL, pool)
    return slab


def reference_forward(ext, params):
    """Pure-JAX reference mirroring the PyTorch semantics for ONE camera set (N, 16)."""
    h = jax.nn.silu(ext @ params["w1"] + params["b1"])
    emb = h @ params["w2"] + params["b2"]
    q = emb @ params["wq"] + params["bq"]
    k = emb @ params["wk"] + params["bk"]
    v = emb @ params["wv"] + params["bv"]
    n = emb.shape[0]
    qh = q.reshape(n, NUM_HEADS, HEAD_DIM)
    kh = k.reshape(n, NUM_HEADS, HEAD_DIM)
    vh = v.reshape(n, NUM_HEADS, HEAD_DIM)
    s = jnp.einsum("qhd,khd->hqk", qh, kh) / math.sqrt(HEAD_DIM)
    p = jax.nn.softmax(s, axis=-1)
    attn = jnp.einsum("hqk,khd->qhd", p, vh).reshape(n, MODEL_CHANNELS)
    attn = attn @ params["wo"] + params["bo"]
    fused = jnp.mean(attn, axis=0, keepdims=True)
    mu = jnp.mean(fused, axis=-1, keepdims=True)
    var = jnp.mean((fused - mu) ** 2, axis=-1, keepdims=True)
    y = (fused - mu) / jnp.sqrt(var + LN_EPS) * params["ln_g"] + params["ln_b"]
    y = jax.nn.silu(y @ params["wp1"] + params["bp1"])
    return y @ params["wp2"] + params["bp2"]


def init_params(key, c):
    c2 = c // 2
    ks = jax.random.split(key, 20)

    def w(k, shape, s=0.02):
        return jax.random.normal(k, shape, jnp.float32) * s

    return {
        "w1": w(ks[0], (16, c2)),  "b1": w(ks[1], (1, c2), 0.01),
        "w2": w(ks[2], (c2, c)),   "b2": w(ks[3], (1, c), 0.01),
        "wq": w(ks[4], (c, c)),    "bq": w(ks[5], (1, c), 0.01),
        "wk": w(ks[6], (c, c)),    "bk": w(ks[7], (1, c), 0.01),
        "wv": w(ks[8], (c, c)),    "bv": w(ks[9], (1, c), 0.01),
        "wo": w(ks[10], (c, c)),   "bo": w(ks[11], (1, c), 0.01),
        "ln_g": jnp.ones((1, c), jnp.float32),
        "ln_b": jnp.zeros((1, c), jnp.float32),
        "wp1": w(ks[12], (c, c)),  "bp1": w(ks[13], (1, c), 0.01),
        "wp2": w(ks[14], (c, c)),  "bp2": w(ks[15], (1, c), 0.01),
    }


def build_extrinsics(key, num_provided, num_cameras):
    """Host-side glue: flatten provided 4x4 extrinsics, pad with identity (as in forward())."""
    mats = jax.random.normal(key, (max(num_provided, 1), 4, 4), jnp.float32)
    flats = [mats[i].reshape(16) for i in range(min(num_provided, num_cameras))]
    while len(flats) < num_cameras:
        flats.append(jnp.eye(4, dtype=jnp.float32).reshape(16))
    return jnp.stack(flats)                                            # (num_cameras, 16)


if __name__ == "__main__":
    root = jax.random.PRNGKey(0)
    k_param, k_cam = jax.random.split(root)

    params = init_params(k_param, MODEL_CHANNELS)
    packed = jax.block_until_ready(pack_params(params))               # one-time host-side packing

    # BATCH independent camera sets; varying numbers of provided cameras exercise the
    # identity-padding path of the PyTorch forward().
    cam_keys = jax.random.split(k_cam, BATCH)
    ext = jnp.concatenate(
        [build_extrinsics(cam_keys[b], num_provided=(b % NUM_CAMERAS) + 1,
                          num_cameras=NUM_CAMERAS) for b in range(BATCH)],
        axis=0)                                                        # (BATCH*N, 16)

    out = jax.block_until_ready(camera_conditioned_flow(ext, packed)) # (BATCH, C)

    ref = jnp.concatenate(
        [reference_forward(ext[b * NUM_CAMERAS:(b + 1) * NUM_CAMERAS], params)
         for b in range(BATCH)], axis=0)

    assert out.shape == (BATCH, MODEL_CHANNELS)
    assert jnp.allclose(out, ref, rtol=1e-3, atol=1e-4), (out, ref)

    print("KERNEL_OK")
</pallas_src>

<mosaic_0001>
module attributes {stable_mosaic.version = 11 : i64} {
  func.func @_kernel(%arg0: memref<16x16xf32, #tpu.memory_space<vmem>>, %arg1: memref<528x128xf32, #tpu.memory_space<vmem>>, %arg2: memref<4x32xf32, #tpu.memory_space<vmem>>) attributes {dimension_semantics = [], scalar_prefetch = 0 : i64, scratch_operands = 0 : i64, tpu.core_type = #tpu.core_type<tc>} {
    %c0 = arith.constant 0 : index
    %c0_0 = arith.constant 0 : index
    %0 = vector.load %arg0[%c0, %c0_0] : memref<16x16xf32, #tpu.memory_space<vmem>>, vector<16x16xf32>
    %c0_1 = arith.constant 0 : index
    %c0_2 = arith.constant 0 : index
    %1 = vector.load %arg1[%c0_1, %c0_2] : memref<528x128xf32, #tpu.memory_space<vmem>>, vector<16x16xf32>
    %c16 = arith.constant 16 : index
    %c0_3 = arith.constant 0 : index
    %2 = vector.load %arg1[%c16, %c0_3] : memref<528x128xf32, #tpu.memory_space<vmem>>, vector<16x96xf32>
    %c32 = arith.constant 32 : index
    %c0_4 = arith.constant 0 : index
    %3 = vector.load %arg1[%c32, %c0_4] : memref<528x128xf32, #tpu.memory_space<vmem>>, vector<32x32xf32>
    %c64 = arith.constant 64 : index
    %c0_5 = arith.constant 0 : index
    %4 = vector.load %arg1[%c64, %c0_5] : memref<528x128xf32, #tpu.memory_space<vmem>>, vector<32x32xf32>
    %c96 = arith.constant 96 : index
    %c0_6 = arith.constant 0 : index
    %5 = vector.load %arg1[%c96, %c0_6] : memref<528x128xf32, #tpu.memory_space<vmem>>, vector<32x32xf32>
    %c128 = arith.constant 128 : index
    %c0_7 = arith.constant 0 : index
    %6 = vector.load %arg1[%c128, %c0_7] : memref<528x128xf32, #tpu.memory_space<vmem>>, vector<8x128xf32>
    %7 = vector.extract_strided_slice %6 {offsets = [0, 0], sizes = [1, 16], strides = [1, 1]} : vector<8x128xf32> to vector<1x16xf32>
    %8 = vector.extract_strided_slice %6 {offsets = [1, 0], sizes = [1, 96], strides = [1, 1]} : vector<8x128xf32> to vector<1x96xf32>
    %9 = vector.extract_strided_slice %6 {offsets = [2, 0], sizes = [1, 32], strides = [1, 1]} : vector<8x128xf32> to vector<1x32xf32>
    %10 = vector.extract_strided_slice %6 {offsets = [3, 0], sizes = [1, 32], strides = [1, 1]} : vector<8x128xf32> to vector<1x32xf32>
    %11 = vector.extract_strided_slice %6 {offsets = [4, 0], sizes = [1, 32], strides = [1, 1]} : vector<8x128xf32> to vector<1x32xf32>
    %12 = vector.extract_strided_slice %6 {offsets = [5, 0], sizes = [1, 32], strides = [1, 1]} : vector<8x128xf32> to vector<1x32xf32>
    %13 = vector.extract_strided_slice %6 {offsets = [6, 0], sizes = [1, 32], strides = [1, 1]} : vector<8x128xf32> to vector<1x32xf32>
    %c136 = arith.constant 136 : index
    %c0_8 = arith.constant 0 : index
    %14 = vector.load %arg1[%c136, %c0_8] : memref<528x128xf32, #tpu.memory_space<vmem>>, vector<128x16xf32>
    %c264 = arith.constant 264 : index
    %c0_9 = arith.constant 0 : index
    %15 = vector.load %arg1[%c264, %c0_9] : memref<528x128xf32, #tpu.memory_space<vmem>>, vector<128x32xf32>
    %c392 = arith.constant 392 : index
    %c0_10 = arith.constant 0 : index
    %16 = vector.load %arg1[%c392, %c0_10] : memref<528x128xf32, #tpu.memory_space<vmem>>, vector<128x128xf32>
    %c520 = arith.constant 520 : index
    %c0_11 = arith.constant 0 : index
    %17 = vector.load %arg1[%c520, %c0_11] : memref<528x128xf32, #tpu.memory_space<vmem>>, vector<4x128xf32>
    %cst = arith.constant dense<0.000000e+00> : vector<16x16xf32>
    %18 = tpu.matmul %0, %1, %cst {dimension_numbers = #tpu.dot_dimension_numbers<[1], [0], [0], [1], [0, 0, 1, 1], [], []>} : vector<16x16xf32>, vector<16x16xf32>, vector<16x16xf32> -> vector<16x16xf32>
    %19 = vector.broadcast %7 : vector<1x16xf32> to vector<16x16xf32>
    %20 = arith.addf %18, %19 : vector<16x16xf32>
    %cst_12 = arith.constant 0.000000e+00 : f32
    %21 = vector.broadcast %cst_12 : f32 to vector<16x16xf32>
    %22 = arith.subf %21, %20 : vector<16x16xf32>
    %23 = math.exp %22 : vector<16x16xf32>
    %cst_13 = arith.constant 1.000000e+00 : f32
    %24 = vector.broadcast %cst_13 : f32 to vector<16x16xf32>
    %25 = arith.addf %24, %23 : vector<16x16xf32>
    %26 = arith.divf %20, %25 : vector<16x16xf32>
    %cst_14 = arith.constant dense<0.000000e+00> : vector<16x96xf32>
    %27 = tpu.matmul %26, %2, %cst_14 {dimension_numbers = #tpu.dot_dimension_numbers<[1], [0], [0], [1], [0, 0, 1, 1], [], []>} : vector<16x16xf32>, vector<16x96xf32>, vector<16x96xf32> -> vector<16x96xf32>
    %28 = vector.broadcast %8 : vector<1x96xf32> to vector<16x96xf32>
    %29 = arith.addf %27, %28 : vector<16x96xf32>
    %cst_15 = arith.constant dense<0.000000e+00> : vector<128x96xf32>
    %30 = tpu.matmul %14, %29, %cst_15 {dimension_numbers = #tpu.dot_dimension_numbers<[1], [0], [0], [1], [0, 0, 1, 1], [], []>} : vector<128x16xf32>, vector<16x96xf32>, vector<128x96xf32> -> vector<128x96xf32>
    %31 = vector.extract_strided_slice %30 {offsets = [0, 0], sizes = [128, 32], strides = [1, 1]} : vector<128x96xf32> to vector<128x32xf32>
    %32 = vector.extract_strided_slice %30 {offsets = [0, 32], sizes = [128, 32], strides = [1, 1]} : vector<128x96xf32> to vector<128x32xf32>
    %33 = arith.mulf %15, %32 : vector<128x32xf32>
    %34 = vector.extract_strided_slice %30 {offsets = [0, 64], sizes = [128, 32], strides = [1, 1]} : vector<128x96xf32> to vector<128x32xf32>
    %35 = arith.mulf %15, %34 : vector<128x32xf32>
    %cst_16 = arith.constant dense<0.000000e+00> : vector<128x128xf32>
    %36 = tpu.matmul %31, %33, %cst_16 {dimension_numbers = #tpu.dot_dimension_numbers<[1], [1], [0], [0], [0, 0, 1, 0], [], []>} : vector<128x32xf32>, vector<128x32xf32>, vector<128x128xf32> -> vector<128x128xf32>
    %37 = arith.addf %36, %16 : vector<128x128xf32>
    %cst_17 = arith.constant dense<0xFF800000> : vector<128xf32>
    %38 = vector.multi_reduction <maximumf>, %37, %cst_17 [1] : vector<128x128xf32> to vector<128xf32>
    %39 = vector.shape_cast %38 : vector<128xf32> to vector<128x1xf32>
    %40 = vector.broadcast %39 : vector<128x1xf32> to vector<128x128xf32>
    %41 = arith.subf %37, %40 : vector<128x128xf32>
    %42 = math.exp %41 : vector<128x128xf32>
    %cst_18 = arith.constant dense<0.000000e+00> : vector<128xf32>
    %43 = vector.multi_reduction <add>, %42, %cst_18 [1] : vector<128x128xf32> to vector<128xf32>
    %44 = vector.shape_cast %43 : vector<128xf32> to vector<128x1xf32>
    %45 = vector.broadcast %44 : vector<128x1xf32> to vector<128x128xf32>
    %46 = arith.divf %42, %45 : vector<128x128xf32>
    %cst_19 = arith.constant dense<0.000000e+00> : vector<128x32xf32>
    %47 = tpu.matmul %46, %35, %cst_19 {dimension_numbers = #tpu.dot_dimension_numbers<[1], [0], [0], [1], [0, 0, 1, 1], [], []>} : vector<128x128xf32>, vector<128x32xf32>, vector<128x32xf32> -> vector<128x32xf32>
    %cst_20 = arith.constant dense<0.000000e+00> : vector<4x32xf32>
    %48 = tpu.matmul %17, %47, %cst_20 {dimension_numbers = #tpu.dot_dimension_numbers<[1], [0], [0], [1], [0, 0, 1, 1], [], []>} : vector<4x128xf32>, vector<128x32xf32>, vector<4x32xf32> -> vector<4x32xf32>
    %cst_21 = arith.constant dense<0.000000e+00> : vector<4x32xf32>
    %49 = tpu.matmul %48, %3, %cst_21 {dimension_numbers = #tpu.dot_dimension_numbers<[1], [0], [0], [1], [0, 0, 1, 1], [], []>} : vector<4x32xf32>, vector<32x32xf32>, vector<4x32xf32> -> vector<4x32xf32>
    %50 = vector.broadcast %9 : vector<1x32xf32> to vector<4x32xf32>
    %51 = arith.addf %49, %50 : vector<4x32xf32>
    %cst_22 = arith.constant dense<0.000000e+00> : vector<4xf32>
    %52 = vector.multi_reduction <add>, %51, %cst_22 [1] : vector<4x32xf32> to vector<4xf32>
    %53 = vector.shape_cast %52 : vector<4xf32> to vector<4x1xf32>
    %cst_23 = arith.constant 3.200000e+01 : f32
    %54 = vector.broadcast %cst_23 : f32 to vector<4x1xf32>
    %55 = arith.divf %53, %54 : vector<4x1xf32>
    %56 = vector.broadcast %55 : vector<4x1xf32> to vector<4x32xf32>
    %57 = arith.subf %51, %56 : vector<4x32xf32>
    %58 = arith.mulf %57, %57 : vector<4x32xf32>
    %cst_24 = arith.constant dense<0.000000e+00> : vector<4xf32>
    %59 = vector.multi_reduction <add>, %58, %cst_24 [1] : vector<4x32xf32> to vector<4xf32>
    %60 = vector.shape_cast %59 : vector<4xf32> to vector<4x1xf32>
    %cst_25 = arith.constant 3.200000e+01 : f32
    %61 = vector.broadcast %cst_25 : f32 to vector<4x1xf32>
    %62 = arith.divf %60, %61 : vector<4x1xf32>
    %63 = vector.broadcast %55 : vector<4x1xf32> to vector<4x32xf32>
    %64 = arith.subf %51, %63 : vector<4x32xf32>
    %cst_26 = arith.constant 9.99999974E-6 : f32
    %65 = vector.broadcast %cst_26 : f32 to vector<4x1xf32>
    %66 = arith.addf %62, %65 : vector<4x1xf32>
    %67 = math.rsqrt %66 : vector<4x1xf32>
    %68 = vector.broadcast %67 : vector<4x1xf32> to vector<4x32xf32>
    %69 = arith.mulf %64, %68 : vector<4x32xf32>
    %70 = vector.broadcast %10 : vector<1x32xf32> to vector<4x32xf32>
    %71 = arith.mulf %69, %70 : vector<4x32xf32>
    %72 = vector.broadcast %11 : vector<1x32xf32> to vector<4x32xf32>
    %73 = arith.addf %71, %72 : vector<4x32xf32>
    %cst_27 = arith.constant dense<0.000000e+00> : vector<4x32xf32>
    %74 = tpu.matmul %73, %4, %cst_27 {dimension_numbers = #tpu.dot_dimension_numbers<[1], [0], [0], [1], [0, 0, 1, 1], [], []>} : vector<4x32xf32>, vector<32x32xf32>, vector<4x32xf32> -> vector<4x32xf32>
    %75 = vector.broadcast %12 : vector<1x32xf32> to vector<4x32xf32>
    %76 = arith.addf %74, %75 : vector<4x32xf32>
    %cst_28 = arith.constant 0.000000e+00 : f32
    %77 = vector.broadcast %cst_28 : f32 to vector<4x32xf32>
    %78 = arith.subf %77, %76 : vector<4x32xf32>
    %79 = math.exp %78 : vector<4x32xf32>
    %cst_29 = arith.constant 1.000000e+00 : f32
    %80 = vector.broadcast %cst_29 : f32 to vector<4x32xf32>
    %81 = arith.addf %80, %79 : vector<4x32xf32>
    %82 = arith.divf %76, %81 : vector<4x32xf32>
    %cst_30 = arith.constant dense<0.000000e+00> : vector<4x32xf32>
    %83 = tpu.matmul %82, %5, %cst_30 {dimension_numbers = #tpu.dot_dimension_numbers<[1], [0], [0], [1], [0, 0, 1, 1], [], []>} : vector<4x32xf32>, vector<32x32xf32>, vector<4x32xf32> -> vector<4x32xf32>
    %84 = vector.broadcast %13 : vector<1x32xf32> to vector<4x32xf32>
    %85 = arith.addf %83, %84 : vector<4x32xf32>
    %c0_31 = arith.constant 0 : index
    %c0_32 = arith.constant 0 : index
    %86 = vector.load %arg2[%c0_31, %c0_32] : memref<4x32xf32, #tpu.memory_space<vmem>>, vector<4x32xf32>
    tpu.vector_store %arg2[%c0_31, %c0_32], %85 {strides = array<i32>} : memref<4x32xf32, #tpu.memory_space<vmem>>, vector<4x32xf32>,
    return
  }
}

</mosaic_0001>

<bundles_post_ra>
// kernel: camera_conditioned_flow.1
= control target key start
LH: loop header
LB: loop body
LE: loop exit
PB: predicated region body
PF: predicated region fallthrough
CT: control target
= control target key end

     0   :  { %7 = vsyncpa [#allocation3], 0  ;;  %s2480_s0 = inlined_call_operand.hbm [shape: f32[16,16], index: 0, kind: input, shape index: {}]   ;;  %s2481_s1 = inlined_call_operand.hbm [shape: f32[528,128], index: 1, kind: input, shape index: {}]   ;;  %s2482_s2 = inlined_call_operand.hbm [shape: f32[4,32], index: 2, kind: output, shape index: {}]  }
   0x1   :  { %8 = vsyncpa [#allocation6], 0 }
   0x2   :  { %9 = vsyncpa [#allocation4], 0  ;;  %s2045_s9 = smov [#allocation2]  }
   0x3   :  { %s15_s10 = sshll.u32 %s2045_s9, 4  ;;  %s16_s10 = int_to_ptr.vmem [resolvable:$true] %s15_s10 }
   0x4   :  { %s1987_s11 = scalar_lea.vmem %s16_s10, 256  ;;  %p1992_p1 = scmp.lt.s32.totalorder %s16_s10, %s16_s10 }
   0x5   :  { %p1988_p0 = scmp.ne.s32.totalorder %s16_s10, %s1987_s11  ;;  %p1993_p2 = scmp.lt.s32.totalorder %s1987_s11, %s1987_s11 }
   0x7   :  { %p1994_p3 = por %p1993_p2, %p1992_p1 }
   0x9   :  { %p1995_p4 = pnand %p1994_p3, %p1988_p0 }
   0xb   :  { %1998 = shalt.err (!%p1995_p4)
}
   0xc   :  { %s2046_s12 = smov 128   ;;  %s2047_s13 = smov 8  }
   0xd   :  { %21 = dma.hbm_to_vmem [thread:$0]  %s2480_s0, 256, %s16_s10, [#allocation3], %s2046_s12, %s2046_s12, %s2047_s13  }
   0xe   :  { %s2048_s16 = smov [#allocation5]  }
   0xf   :  { %s27_s17 = sshll.u32 %s2048_s16, 4  ;;  %s28_s17 = int_to_ptr.vmem [resolvable:$true] %s27_s17 }
  0x10   :  { %s2007_s18 = scalar_lea.vmem %s28_s17, 8448  ;;  %p2012_p6 = scmp.lt.s32.totalorder %s28_s17, %s28_s17 }
  0x11   :  { %p2008_p5 = scmp.ne.s32.totalorder %s28_s17, %s2007_s18  ;;  %p2013_p7 = scmp.lt.s32.totalorder %s2007_s18, %s2007_s18 }
  0x13   :  { %p2014_p8 = por %p2013_p7, %p2012_p6 }
  0x15   :  { %p2015_p9 = pnand %p2014_p8, %p2008_p5 }
  0x17   :  { %2018 = shalt.err (!%p2015_p9)
}
  0x18   :  { %33 = dma.hbm_to_vmem [thread:$0]  %s2481_s1, 8448, %s28_s17, [#allocation6], %s2046_s12, %s2046_s12, %s2047_s13  }
  0x19   :  { %2039 = dma.done.wait [#allocation3], 256  }
  0x1a   :  { %2040 = vsyncadd [#allocation3], 4294967040 }
  0x1b   :  { %2041 = dma.done.wait [#allocation6], 8448  }
  0x1c   :  { %2042 = vsyncadd [#allocation6], 4294958848  ;;  %vm112_vm0 = vcmask 130048   ;;  %v43_v0 = vld [vmem:[#allocation5 + $0x8] sm:$0xff]  ;;  %v42_v1 = vld [vmem:[#allocation5] sm:$0xff]  ;;  %v108_v6 = vlaneseq  ;;  %vm628_vm1 = vcmask 261120  }
  0x1d   :  { %v40_v2 = vld [vmem:[#allocation2] sm:$0xff]  ;;  %1669 = vmatprep.subr.mxu0 %v43_v0  ;;  %v41_v3 = vld [vmem:[#allocation2 + $0x8] sm:$0xff]  ;;  %v58_v9 = vld [vmem:[#allocation5 + $0x80] sm:$0xff]  ;;  %s2049_s0 = smov 96   ;;  %s2050_s1 = smov 64   ;;  %vm2052_vm2 = vmmov 0  }
  0x1e   :  { %1673 = vmatprep.mubr.msk.f32.mxu0 %vm112_vm0, %v40_v2  ;;  %1670 = vmatpush3.msra.mxu0 %v43_v0  ;;  %v45_v4 = vld [vmem:[#allocation5 + $0x18] sm:$0xff]  ;;  %v44_v5 = vld [vmem:[#allocation5 + $0x10] sm:$0xff]  ;;  %v2077_v7 = vshrl.u32 %v108_v6, 7  ;;  %v59_v27 = vld [vmem:[#allocation5 + $0x88] sm:$0xff]  ;;  %vm1290_vm3 = vcmask 257024   ;;  %s2053_s21 = smov [#allocation7]  }
  0x1f   :  { %1671 = vmatprep.subr.mxu0 %v42_v1  ;;  %1676 = vmatprep.subr.mxu1 %v45_v4  ;;  %v60_v34 = vld [vmem:[#allocation5 + $0x90] sm:$0xff]  ;;  %v61_v35 = vld [vmem:[#allocation5 + $0x98] sm:$0xff]  ;;  %v62_v36 = vld [vmem:[#allocation5 + $0xa0] sm:$0xff]  ;;  %s1482_s22 = sshll.u32 %s2053_s21, 4  ;;  %s1483_s22 = int_to_ptr.vmem [resolvable:$true] %s1482_s22 }
  0x20   :  { %1672 = vmatpush3.msra.mxu0 %v42_v1  ;;  %1677 = vmatpush3.msra.mxu1 %v45_v4  ;;  %v110_v8 = vsub.s32 0, %v2077_v7  ;;  %v208_v28 = vsub.s32 1, %v2077_v7  ;;  %v63_v37 = vld [vmem:[#allocation5 + $0xa8] sm:$0xff]  ;;  %v64_v38 = vld [vmem:[#allocation5 + $0xb0] sm:$0xff]  ;;  %v65_v39 = vld [vmem:[#allocation5 + $0xb8] sm:$0xff]  ;;  %s2019_s23 = scalar_lea.vmem %s1483_s22, 64  ;;  %p2024_p11 = scmp.lt.s32.totalorder %s1483_s22, %s1483_s22 }
  0x21   :  { %1674 = vmatmul.mubr.msk.f32.vlgmr.msra.gmra.mxu0 %vm112_vm0, %v41_v3  ;;  %1678 = vmatprep.subr.mxu1 %v44_v5  ;;  %v66_v40 = vld [vmem:[#allocation5 + $0xc0] sm:$0xff]  ;;  %v67_v41 = vld [vmem:[#allocation5 + $0xc8] sm:$0xff]  ;;  %v68_v42 = vld [vmem:[#allocation5 + $0xd0] sm:$0xff]  ;;  %p2020_p10 = scmp.ne.s32.totalorder %s1483_s22, %s2019_s23  ;;  %p2025_p12 = scmp.lt.s32.totalorder %s2019_s23, %s2019_s23 }
  0x22   :  { %1679 = vmatpush3.msra.mxu1 %v44_v5  ;;  %v111_v10 = vrot.slane %v58_v9, %v110_v8  ;;  %1687 = vmatprep.mubr.msk.f32.mxu0 %vm112_vm0, %v59_v27  ;;  %v209_v29 = vrot.slane %v58_v9, %v208_v28  ;;  %v69_v43 = vld [vmem:[#allocation5 + $0xd8] sm:$0xff]  ;;  %v70_v44 = vld [vmem:[#allocation5 + $0xe0] sm:$0xff]  ;;  %v71_v45 = vld [vmem:[#allocation5 + $0xe8] sm:$0xff] }
  0x23   :  { %v72_v46 = vld [vmem:[#allocation5 + $0xf0] sm:$0xff]  ;;  %v73_v47 = vld [vmem:[#allocation5 + $0xf8] sm:$0xff]  ;;  %v74_v48 = vld [vmem:[#allocation5 + $0x100] sm:$0xff]  ;;  %p2026_p13 = por %p2025_p12, %p2024_p11 }
  0x24   :  { %v90_v2 = vld [vmem:[#allocation5 + $0x180] sm:$0xff]  ;;  %v2173_v6 = vld [vmem:[#allocation5 + $0x178] sm:$0xff]  ;;  %v2176_v8 = vld [vmem:[#allocation5 + $0x170] sm:$0xff] }
  0x25   :  { %p2027_p0 = pnand %p2026_p13, %p2020_p10 }
  0xe1   :  { %v1675_v11 = vpop.f32.mrf.mxu0 }
  0xe2   :  { %v191_v12 = vadd.f32 %v1675_v11, %v111_v10 }
  0xe3   :  { %v185_v13 = vpop.f32.mrf.mxu0 }
  0xe4   :  { %v195_v14 = vsub.f32 0.0, %v191_v12  ;;  %v186_v15 = vadd.f32 %v185_v13, %v111_v10  ;;  %v2182_v13 = vld [vmem:[#allocation5 + $0x168] sm:$0xff] }
  0xe6   :  { %v198_v16 = vmul.f32 1.442695, %v195_v14  ;;  %v194_v17 = vsub.f32 0.0, %v186_v15 }
  0xe8   :  { %1900 = vpow2.f32 %v198_v16  ;;  %v196_v18 = vmul.f32 1.442695, %v194_v17  ;;  %v2187_v17 = vld [vmem:[#allocation5 + $0x160] sm:$0xff] }
  0xea   :  { %1902 = vpow2.f32 %v196_v18 }
  0xf5   :  { %v1901_v19 = vpop.eup %1900 }
  0xf6   :  { %v201_v20 = vadd.f32 1.0, %v1901_v19 }
  0xf7   :  { %v1903_v21 = vpop.eup %1902 }
  0xf8   :  { %v200_v22 = vadd.f32 1.0, %v1903_v21  ;;  %1904 = vrcp.f32 %v201_v20  ;;  %v2192_v21 = vld [vmem:[#allocation5 + $0x158] sm:$0xff] }
  0xfa   :  { %1906 = vrcp.f32 %v200_v22 }
 0x105   :  { %v1905_v23 = vpop.eup %1904 }
 0x106   :  { %v205_v26 = vmul.f32 %v1905_v23, %v191_v12 }
 0x107   :  { %v1907_v24 = vpop.eup %1906 }
 0x108   :  { %v203_v25 = vmul.f32 %v1907_v24, %v186_v15 }
 0x10a   :  { %1680 = vmatprep.mubr.msk.f32.mxu1 %vm112_vm0, %v203_v25  ;;  %v2197_v25 = vld [vmem:[#allocation5 + $0x150] sm:$0xff] }
 0x10b   :  { %1681 = vmatmul.mubr.msk.f32.vlgmr.msra.gmra.mxu1 %vm112_vm0, %v205_v26 }
 0x1cb   :  { %v1682_v30 = vpop.f32.mrf.mxu1 }
 0x1cc   :  { %v288_v31 = vadd.f32 %v1682_v30, %v209_v29 }
 0x1cd   :  { %v282_v32 = vpop.f32.mrf.mxu1 }
 0x1ce   :  { %v283_v33 = vadd.f32 %v282_v32, %v209_v29  ;;  %1683 = vmatprep.subr.mxu0 %v288_v31  ;;  %v2202_v29 = vld [vmem:[#allocation5 + $0x148] sm:$0xff] }
 0x1cf   :  { %1684 = vmatpush3.msra.mxu0 %v288_v31 }
 0x1d0   :  { %1685 = vmatprep.subr.mxu0 %v283_v33 }
 0x1d1   :  { %1686 = vmatpush3.msra.mxu0 %v283_v33  ;;  %v2207_v33 = vld [vmem:[#allocation5 + $0x140] sm:$0xff] }
 0x1d2   :  { %1688 = vmatmul.mubr.msk.f32.vlgmr.msra.gmra.mxu0 %vm112_vm0, %v60_v34 }
 0x1d3   :  { %1690 = vmatprep.mubr.msk.f32.mxu0 %vm112_vm0, %v61_v35 }
 0x1d6   :  { %1691 = vmatmul.mubr.msk.f32.gmra.mxu0 %vm112_vm0, %v62_v36 }
 0x1d7   :  { %1693 = vmatprep.mubr.msk.f32.mxu0 %vm112_vm0, %v63_v37 }
 0x1da   :  { %1694 = vmatmul.mubr.msk.f32.gmra.mxu0 %vm112_vm0, %v64_v38  ;;  %v2212_v38 = vld [vmem:[#allocation5 + $0x138] sm:$0xff] }
 0x1db   :  { %1696 = vmatprep.mubr.msk.f32.mxu0 %vm112_vm0, %v65_v39 }
 0x1de   :  { %1697 = vmatmul.mubr.msk.f32.gmra.mxu0 %vm112_vm0, %v66_v40 }
 0x1df   :  { %1699 = vmatprep.mubr.msk.f32.mxu0 %vm112_vm0, %v67_v41  ;;  %v2217_v41 = vld [vmem:[#allocation5 + $0x130] sm:$0xff] }
 0x1e2   :  { %1700 = vmatmul.mubr.msk.f32.gmra.mxu0 %vm112_vm0, %v68_v42 }
 0x1e3   :  { %1702 = vmatprep.mubr.msk.f32.mxu0 %vm112_vm0, %v69_v43 }
 0x1e6   :  { %1703 = vmatmul.mubr.msk.f32.gmra.mxu0 %vm112_vm0, %v70_v44  ;;  %v2222_v44 = vld [vmem:[#allocation5 + $0x128] sm:$0xff] }
 0x1e7   :  { %1705 = vmatprep.mubr.msk.f32.mxu0 %vm112_vm0, %v71_v45 }
 0x1ea   :  { %1706 = vmatmul.mubr.msk.f32.gmra.mxu0 %vm112_vm0, %v72_v46 }
 0x1eb   :  { %1708 = vmatprep.mubr.msk.f32.mxu0 %vm112_vm0, %v73_v47  ;;  %v2227_v47 = vld [vmem:[#allocation5 + $0x120] sm:$0xff] }
 0x1ee   :  { %1709 = vmatmul.mubr.msk.f32.gmra.mxu0 %vm112_vm0, %v74_v48 }
 0x292   :  { %v2099_v49 = vpop.f32.mrf.mxu0 }
 0x294   :  { %v2101_v50 = vpop.f32.mrf.mxu0 }
 0x295   :  { %1743 = vmatprep.mubr.msk.f32.mxu1 %vm628_vm1, %v2101_v50 }
 0x296   :  { %v2105_v51 = vpop.f32.mrf.mxu0 }
 0x298   :  { %v2107_v52 = vpop.f32.mrf.mxu0 }
 0x29a   :  { %v2109_v53 = vpop.f32.mrf.mxu0 }
 0x29c   :  { %v2111_v54 = vpop.f32.mrf.mxu0 }
 0x29e   :  { %v2113_v55 = vpop.f32.mrf.mxu0 }
 0x2a0   :  { %v2115_v56 = vpop.f32.mrf.mxu0 }
 0x2a2   :  { %v2117_v57 = vpop.f32.mrf.mxu0 }
 0x2a4   :  { %v2119_v58 = vpop.f32.mrf.mxu0 }
 0x2a6   :  { %v2121_v59 = vpop.f32.mrf.mxu0 }
 0x2a8   :  { %v2123_v60 = vpop.f32.mrf.mxu0 }
 0x2aa   :  { %v2125_v61 = vpop.f32.mrf.mxu0 }
 0x2ab   :  { %526 = vrot.lane.b32.xlu1 %v2125_v61, %s2049_s0 }
 0x2ac   :  { %v2128_v62 = vpop.f32.mrf.mxu0 }
 0x2ae   :  { %v2130_v63 = vpop.f32.mrf.mxu0 }
 0x2af   :  { %524 = vrot.lane.b32.xlu1 %v2128_v62, %s2049_s0  ;;  %530 = vrot.lane.b32.xlu0 %v2130_v63, %s2049_s0 }
 0x2b0   :  { %v2134_v0 = vpop.f32.mrf.mxu0 }
 0x2b3   :  { %520 = vrot.lane.b32.xlu1 %v2123_v60, %s2049_s0  ;;  %528 = vrot.lane.b32.xlu0 %v2134_v0, %s2049_s0 }
 0x2b7   :  { %516 = vrot.lane.b32.xlu1 %v2119_v58, %s2049_s0  ;;  %522 = vrot.lane.b32.xlu0 %v2121_v59, %s2049_s0 }
 0x2bb   :  { %512 = vrot.lane.b32.xlu1 %v2115_v56, %s2049_s0  ;;  %518 = vrot.lane.b32.xlu0 %v2117_v57, %s2049_s0 }
 0x2bf   :  { %508 = vrot.lane.b32.xlu1 %v2111_v54, %s2049_s0  ;;  %514 = vrot.lane.b32.xlu0 %v2113_v55, %s2049_s0 }
 0x2c3   :  { %504 = vrot.lane.b32.xlu1 %v2107_v52, %s2049_s0  ;;  %510 = vrot.lane.b32.xlu0 %v2109_v53, %s2049_s0 }
 0x2c7   :  { %500 = vrot.lane.b32.xlu1 %v2101_v50, %s2049_s0  ;;  %506 = vrot.lane.b32.xlu0 %v2105_v51, %s2049_s0 }
 0x2cb   :  { %594 = vrot.lane.b32.xlu1 %v2130_v63, %s2050_s1  ;;  %502 = vrot.lane.b32.xlu0 %v2099_v49, %s2049_s0 }
 0x2cf   :  { %590 = vrot.lane.b32.xlu1 %v2125_v61, %s2050_s1  ;;  %588 = vrot.lane.b32.xlu0 %v2128_v62, %s2050_s1 }
 0x2d3   :  { %586 = vrot.lane.b32.xlu1 %v2121_v59, %s2050_s1  ;;  %584 = vrot.lane.b32.xlu0 %v2123_v60, %s2050_s1 }
 0x2d7   :  { %580 = vrot.lane.b32.xlu1 %v2119_v58, %s2050_s1  ;;  %582 = vrot.lane.b32.xlu0 %v2117_v57, %s2050_s1 }
 0x2db   :  { %574 = vrot.lane.b32.xlu1 %v2109_v53, %s2050_s1  ;;  %578 = vrot.lane.b32.xlu0 %v2113_v55, %s2050_s1 }
 0x2df   :  { %576 = vrot.lane.b32.xlu0 %v2115_v56, %s2050_s1 }
 0x2e3   :  { %572 = vrot.lane.b32.xlu0 %v2111_v54, %s2050_s1 }
 0x2e7   :  { %592 = vrot.lane.b32.xlu0 %v2134_v0, %s2050_s1 }
 0x31d   :  { %v527_v1 = vpop.permute.xlu1 %526 }
 0x31e   :  { %v561_v12 = vmul.f32 %v527_v1, %v2176_v8 }
 0x321   :  { %v525_v3 = vpop.permute.xlu1 %524  ;;  %v531_v4 = vpop.permute.xlu0 %530 }
 0x322   :  { %v563_v5 = vmul.f32 %v531_v4, %v90_v2  ;;  %v560_v16 = vmul.f32 %v525_v3, %v2182_v13 }
 0x324   :  { %1711 = vmatprep.subr.msk.mxu1 %vm628_vm1, %v563_v5 }
 0x325   :  { %v521_v9 = vpop.permute.xlu1 %520  ;;  %1712 = vmatpush3.xpose.msk.msra.mxu1 %vm628_vm1, %v563_v5  ;;  %v529_v10 = vpop.permute.xlu0 %528  ;;  %v2237_v5 = vld [vmem:[#allocation5 + $0x110] sm:$0xff] }
 0x326   :  { %v562_v11 = vmul.f32 %v529_v10, %v2173_v6  ;;  %v558_v24 = vmul.f32 %v521_v9, %v2192_v21 }
 0x328   :  { %1713 = vmatprep.subr.msk.mxu1 %vm628_vm1, %v562_v11 }
 0x329   :  { %v517_v14 = vpop.permute.xlu1 %516  ;;  %1714 = vmatpush3.xpose.msk.msra.mxu1 %vm628_vm1, %v562_v11  ;;  %v523_v15 = vpop.permute.xlu0 %522 }
 0x32a   :  { %1715 = vmatprep.subr.msk.mxu1 %vm628_vm1, %v561_v12  ;;  %v559_v20 = vmul.f32 %v523_v15, %v2187_v17  ;;  %v556_v32 = vmul.f32 %v517_v14, %v2202_v29 }
 0x32d   :  { %v513_v18 = vpop.permute.xlu1 %512  ;;  %1716 = vmatpush3.xpose.msk.msra.mxu1 %vm628_vm1, %v561_v12  ;;  %v519_v19 = vpop.permute.xlu0 %518  ;;  %v2242_v12 = vld [vmem:[#allocation5 + $0x108] sm:$0xff] }
 0x32e   :  { %1717 = vmatprep.subr.msk.mxu1 %vm628_vm1, %v560_v16  ;;  %v557_v28 = vmul.f32 %v519_v19, %v2197_v25  ;;  %v554_v40 = vmul.f32 %v513_v18, %v2212_v38 }
 0x331   :  { %v509_v22 = vpop.permute.xlu1 %508  ;;  %1718 = vmatpush3.xpose.msk.msra.mxu1 %vm628_vm1, %v560_v16  ;;  %v515_v23 = vpop.permute.xlu0 %514 }
 0x332   :  { %1719 = vmatprep.subr.msk.mxu1 %vm628_vm1, %v559_v20  ;;  %v555_v37 = vmul.f32 %v515_v23, %v2207_v33  ;;  %v552_v46 = vmul.f32 %v509_v22, %v2222_v44 }
 0x335   :  { %v505_v26 = vpop.permute.xlu1 %504  ;;  %1720 = vmatpush3.xpose.msk.msra.mxu1 %vm628_vm1, %v559_v20  ;;  %v511_v27 = vpop.permute.xlu0 %510 }
 0x336   :  { %1721 = vmatprep.subr.msk.mxu1 %vm628_vm1, %v558_v24  ;;  %v553_v43 = vmul.f32 %v511_v27, %v2217_v41 }
 0x339   :  { %v501_v30 = vpop.permute.xlu1 %500  ;;  %1722 = vmatpush3.xpose.msk.msra.mxu1 %vm628_vm1, %v558_v24  ;;  %v507_v31 = vpop.permute.xlu0 %506 }
 0x33a   :  { %1723 = vmatprep.subr.msk.mxu1 %vm628_vm1, %v557_v28  ;;  %v551_v1 = vmul.f32 %v507_v31, %v2227_v47  ;;  %v548_v16 = vmul.f32 %v501_v30, %v2242_v12  ;;  %v96_v31 = vld [vmem:[#allocation5 + $0x1b0] sm:$0xff] }
 0x33d   :  { %v595_v34 = vpop.permute.xlu1 %594  ;;  %1724 = vmatpush3.xpose.msk.msra.mxu1 %vm628_vm1, %v557_v28  ;;  %v503_v35 = vpop.permute.xlu0 %502 }
 0x33e   :  { %v627_v36 = vmul.f32 %v595_v34, %v90_v2  ;;  %1725 = vmatprep.subr.msk.mxu1 %vm628_vm1, %v556_v32  ;;  %v2232_v2 = vld [vmem:[#allocation5 + $0x118] sm:$0xff]  ;;  %v549_v11 = vmul.f32 %v503_v35, %v2237_v5 }
 0x33f   :  { %v550_v4 = vmul.f32 %v505_v26, %v2232_v2 }
 0x340   :  { %1767 = vmatprep.subr.mxu0 %v627_v36 }
 0x341   :  { %1768 = vmatpush3.msra.mxu0 %v627_v36  ;;  %1726 = vmatpush3.xpose.msk.msra.mxu1 %vm628_vm1, %v556_v32  ;;  %v589_v39 = vpop.permute.xlu0 %588  ;;  %v591_v10 = vpop.permute.xlu1 %590 }
 0x342   :  { %1727 = vmatprep.subr.msk.mxu1 %vm628_vm1, %v555_v37  ;;  %v625_v18 = vmul.f32 %v591_v10, %v2176_v8  ;;  %v624_v20 = vmul.f32 %v589_v39, %v2182_v13  ;;  %v99_v39 = vld [vmem:[#allocation5 + $0x1c8] sm:$0xff] }
 0x345   :  { %1728 = vmatpush3.xpose.msk.msra.mxu1 %vm628_vm1, %v555_v37  ;;  %v585_v42 = vpop.permute.xlu0 %584  ;;  %v587_v19 = vpop.permute.xlu1 %586  ;;  %v98_v37 = vld [vmem:[#allocation5 + $0x1c0] sm:$0xff] }
 0x346   :  { %1729 = vmatprep.subr.msk.mxu1 %vm628_vm1, %v554_v40  ;;  %v623_v22 = vmul.f32 %v587_v19, %v2187_v17 }
 0x349   :  { %1730 = vmatpush3.xpose.msk.msra.mxu1 %vm628_vm1, %v554_v40  ;;  %v583_v45 = vpop.permute.xlu0 %582  ;;  %v581_v8 = vpop.permute.xlu1 %580 }
 0x34a   :  { %1731 = vmatprep.subr.msk.mxu1 %vm628_vm1, %v553_v43  ;;  %v621_v23 = vmul.f32 %v583_v45, %v2197_v25  ;;  %v620_v13 = vmul.f32 %v581_v8, %v2202_v29  ;;  %v101_v45 = vld [vmem:[#allocation5 + $0x1d8] sm:$0xff] }
 0x34d   :  { %1732 = vmatpush3.xpose.msk.msra.mxu1 %vm628_vm1, %v553_v43  ;;  %v579_v48 = vpop.permute.xlu0 %578  ;;  %v100_v43 = vld [vmem:[#allocation5 + $0x1d0] sm:$0xff] }
 0x34e   :  { %1733 = vmatprep.subr.msk.mxu1 %vm628_vm1, %v552_v46  ;;  %v619_v17 = vmul.f32 %v579_v48, %v2207_v33  ;;  %v97_v33 = vld [vmem:[#allocation5 + $0x1b8] sm:$0xff] }
 0x351   :  { %1734 = vmatpush3.xpose.msk.msra.mxu1 %vm628_vm1, %v552_v46  ;;  %v577_v3 = vpop.permute.xlu0 %576 }
 0x352   :  { %1735 = vmatprep.subr.msk.mxu1 %vm628_vm1, %v551_v1  ;;  %v618_v24 = vmul.f32 %v577_v3, %v2212_v38  ;;  %v102_v3 = vld [vmem:[#allocation5 + $0x1e0] sm:$0xff] }
 0x355   :  { %1736 = vmatpush3.xpose.msk.msra.mxu1 %vm628_vm1, %v551_v1  ;;  %v573_v9 = vpop.permute.xlu0 %572 }
 0x356   :  { %1737 = vmatprep.subr.msk.mxu1 %vm628_vm1, %v550_v4  ;;  %v616_v26 = vmul.f32 %v573_v9, %v2222_v44  ;;  %v103_v9 = vld [vmem:[#allocation5 + $0x1e8] sm:$0xff] }
 0x359   :  { %1738 = vmatpush3.xpose.msk.msra.mxu1 %vm628_vm1, %v550_v4  ;;  %v593_v14 = vpop.permute.xlu0 %592 }
 0x35a   :  { %v626_v15 = vmul.f32 %v593_v14, %v2173_v6  ;;  %1739 = vmatprep.subr.msk.mxu1 %vm628_vm1, %v549_v11  ;;  %v622_v6 = vmul.f32 %v585_v42, %v2192_v21  ;;  %v575_v21 = vpop.permute.xlu1 %574 }
 0x35b   :  { %v617_v25 = vmul.f32 %v575_v21, %v2217_v41 }
 0x35c   :  { %1769 = vmatprep.subr.mxu0 %v626_v15 }
 0x35d   :  { %1740 = vmatpush3.xpose.msk.msra.mxu1 %vm628_vm1, %v549_v11  ;;  %1770 = vmatpush3.msra.mxu0 %v626_v15  ;;  %v104_v15 = vld [vmem:[#allocation5 + $0x1f0] sm:$0xff] }
 0x35e   :  { %1741 = vmatprep.subr.msk.mxu1 %vm628_vm1, %v548_v16  ;;  %1771 = vmatprep.subr.mxu0 %v625_v18 }
 0x35f   :  { %1772 = vmatpush3.msra.mxu0 %v625_v18  ;;  %v105_v18 = vld [vmem:[#allocation5 + $0x1f8] sm:$0xff] }
 0x360   :  { %1773 = vmatprep.subr.mxu0 %v624_v20 }
 0x361   :  { %1742 = vmatpush3.xpose.msk.msra.mxu1 %vm628_vm1, %v548_v16  ;;  %1774 = vmatpush3.msra.mxu0 %v624_v20 }
 0x362   :  { %1775 = vmatprep.subr.mxu0 %v623_v22 }
 0x363   :  { %1776 = vmatpush3.msra.mxu0 %v623_v22 }
 0x364   :  { %1744 = vmatmul.mubr.msk.f32.vlgmr.msra.gmra.mxu1 %vm628_vm1, %v2099_v49  ;;  %1777 = vmatprep.subr.mxu0 %v622_v6 }
 0x365   :  { %1746 = vmatprep.mubr.msk.f32.mxu1 %vm628_vm1, %v2107_v52  ;;  %1778 = vmatpush3.msra.mxu0 %v622_v6  ;;  %v106_v6 = vld [vmem:[#allocation5 + $0x200] sm:$0xff] }
 0x366   :  { %1779 = vmatprep.subr.mxu0 %v621_v23 }
 0x367   :  { %1780 = vmatpush3.msra.mxu0 %v621_v23 }
 0x368   :  { %1747 = vmatmul.mubr.msk.f32.gmra.mxu1 %vm628_vm1, %v2105_v51  ;;  %1781 = vmatprep.subr.mxu0 %v620_v13 }
 0x369   :  { %1749 = vmatprep.mubr.msk.f32.mxu1 %vm628_vm1, %v2111_v54  ;;  %1782 = vmatpush3.msra.mxu0 %v620_v13 }
 0x36a   :  { %1783 = vmatprep.subr.mxu0 %v619_v17 }
 0x36b   :  { %1784 = vmatpush3.msra.mxu0 %v619_v17 }
 0x36c   :  { %1750 = vmatmul.mubr.msk.f32.gmra.mxu1 %vm628_vm1, %v2109_v53  ;;  %1785 = vmatprep.subr.mxu0 %v618_v24  ;;  %v92_v53 = vld [vmem:[#allocation5 + $0x190] sm:$0xff] }
 0x36d   :  { %1752 = vmatprep.mubr.msk.f32.mxu1 %vm628_vm1, %v2115_v56  ;;  %1786 = vmatpush3.msra.mxu0 %v618_v24 }
 0x36e   :  { %1787 = vmatprep.subr.mxu0 %v617_v25 }
 0x36f   :  { %1788 = vmatpush3.msra.mxu0 %v617_v25 }
 0x370   :  { %1753 = vmatmul.mubr.msk.f32.gmra.mxu1 %vm628_vm1, %v2113_v55  ;;  %1789 = vmatprep.subr.mxu0 %v616_v26  ;;  %v91_v55 = vld [vmem:[#allocation5 + $0x188] sm:$0xff] }
 0x371   :  { %1755 = vmatprep.mubr.msk.f32.mxu1 %vm628_vm1, %v2119_v58  ;;  %1790 = vmatpush3.msra.mxu0 %v616_v26 }
 0x374   :  { %1756 = vmatmul.mubr.msk.f32.gmra.mxu1 %vm628_vm1, %v2117_v57 }
 0x375   :  { %1758 = vmatprep.mubr.msk.f32.mxu1 %vm628_vm1, %v2123_v60 }
 0x378   :  { %1759 = vmatmul.mubr.msk.f32.gmra.mxu1 %vm628_vm1, %v2121_v59  ;;  %v94_v59 = vld [vmem:[#allocation5 + $0x1a0] sm:$0xff] }
 0x379   :  { %1761 = vmatprep.mubr.msk.f32.mxu1 %vm628_vm1, %v2128_v62 }
 0x37c   :  { %1762 = vmatmul.mubr.msk.f32.gmra.mxu1 %vm628_vm1, %v2125_v61 }
 0x37d   :  { %1764 = vmatprep.mubr.msk.f32.mxu1 %vm628_vm1, %v2134_v0  ;;  %v93_v0 = vld [vmem:[#allocation5 + $0x198] sm:$0xff] }
 0x380   :  { %1765 = vmatmul.mubr.msk.f32.gmra.mxu1 %vm628_vm1, %v2130_v63  ;;  %v95_v63 = vld [vmem:[#allocation5 + $0x1a8] sm:$0xff] }
 0x424   :  { %v1745_v54 = vpop.f32.mrf.mxu1 }
 0x425   :  { %v2291_v56 = vadd.f32 %v1745_v54, %v92_v53 }
 0x426   :  { %v775_v57 = vpop.f32.mrf.mxu1 }
 0x427   :  { %v2293_v58 = vadd.f32 %v775_v57, %v91_v55  ;;  %856 = vmax.xlane.f32.xlu1 %v2291_v56 }
 0x428   :  { %v1748_v60 = vpop.f32.mrf.mxu1 }
 0x429   :  { %854 = vmax.xlane.f32.xlu0 %v2293_v58  ;;  %v2297_v62 = vadd.f32 %v1748_v60, %v94_v59 }
 0x42a   :  { %v785_v61 = vpop.f32.mrf.mxu1 }
 0x42b   :  { %v786_v29 = vadd.f32 %v785_v61, %v93_v0 }
 0x42c   :  { %v1751_v27 = vpop.f32.mrf.mxu1 }
 0x42d   :  { %860 = vmax.xlane.f32.xlu0 %v2297_v62  ;;  %v801_v35 = vadd.f32 %v1751_v27, %v96_v31 }
 0x42e   :  { %v795_v28 = vpop.f32.mrf.mxu1 }
 0x42f   :  { %v2300_v30 = vadd.f32 %v795_v28, %v95_v63 }
 0x430   :  { %v1754_v32 = vpop.f32.mrf.mxu1 }
 0x431   :  { %862 = vmax.xlane.f32.xlu1 %v2300_v30  ;;  %858 = vmax.xlane.f32.xlu0 %v786_v29  ;;  %v2306_v41 = vadd.f32 %v1754_v32, %v98_v37 }
 0x432   :  { %v805_v34 = vpop.f32.mrf.mxu1 }
 0x433   :  { %v2303_v36 = vadd.f32 %v805_v34, %v97_v33 }
 0x434   :  { %v1757_v38 = vpop.f32.mrf.mxu1 }
 0x435   :  { %866 = vmax.xlane.f32.xlu1 %v2303_v36  ;;  %864 = vmax.xlane.f32.xlu0 %v801_v35  ;;  %v2312_v48 = vadd.f32 %v1757_v38, %v100_v43 }
 0x436   :  { %v815_v40 = vpop.f32.mrf.mxu1 }
 0x437   :  { %v2308_v42 = vadd.f32 %v815_v40, %v99_v39 }
 0x438   :  { %v1760_v44 = vpop.f32.mrf.mxu1 }
 0x439   :  { %870 = vmax.xlane.f32.xlu1 %v2308_v42  ;;  %868 = vmax.xlane.f32.xlu0 %v2306_v41  ;;  %v2318_v11 = vadd.f32 %v1760_v44, %v102_v3 }
 0x43a   :  { %v825_v46 = vpop.f32.mrf.mxu1 }
 0x43b   :  { %v2314_v1 = vadd.f32 %v825_v46, %v101_v45 }
 0x43c   :  { %v1763_v4 = vpop.f32.mrf.mxu1 }
 0x43d   :  { %874 = vmax.xlane.f32.xlu1 %v2314_v1  ;;  %872 = vmax.xlane.f32.xlu0 %v2312_v48  ;;  %v2324_v20 = vadd.f32 %v1763_v4, %v104_v15 }
 0x43e   :  { %v835_v10 = vpop.f32.mrf.mxu1 }
 0x43f   :  { %v2320_v14 = vadd.f32 %v835_v10, %v103_v9 }
 0x440   :  { %v1766_v16 = vpop.f32.mrf.mxu1 }
 0x441   :  { %878 = vmax.xlane.f32.xlu1 %v2320_v14  ;;  %876 = vmax.xlane.f32.xlu0 %v2318_v11  ;;  %v2330_v8 = vadd.f32 %v1766_v16, %v106_v6 }
 0x442   :  { %v845_v19 = vpop.f32.mrf.mxu1 }
 0x443   :  { %v2326_v22 = vadd.f32 %v845_v19, %v105_v18 }
 0x445   :  { %882 = vmax.xlane.f32.xlu1 %v2326_v22  ;;  %880 = vmax.xlane.f32.xlu0 %v2324_v20 }
 0x449   :  { %884 = vmax.xlane.f32.xlu0 %v2330_v8 }
 0x456   :  { %570 = vrot.lane.b32.xlu1 %v2105_v51, %s2050_s1 }
 0x45f   :  { %568 = vrot.lane.b32.xlu0 %v2107_v52, %s2050_s1 }
 0x4b0   :  { %v857_v23 = vpop.xlane.xlu1 %856 }
 0x4b1   :  { %v887_v13 = vsub.f32 %v2291_v56, %v857_v23 }
 0x4b2   :  { %v855_v17 = vpop.xlane.xlu0 %854 }
 0x4b3   :  { %v904_v21 = vmul.f32 1.442695, %v887_v13  ;;  %v886_v24 = vsub.f32 %v2293_v58, %v855_v17 }
 0x4b5   :  { %1908 = vpow2.f32 %v904_v21  ;;  %v902_v25 = vmul.f32 1.442695, %v886_v24 }
 0x4b6   :  { %v861_v26 = vpop.xlane.xlu0 %860 }
 0x4b7   :  { %1910 = vpow2.f32 %v902_v25  ;;  %v889_v45 = vsub.f32 %v2297_v62, %v861_v26 }
 0x4b9   :  { %v908_v46 = vmul.f32 1.442695, %v889_v45 }
 0x4ba   :  { %v863_v53 = vpop.xlane.xlu1 %862  ;;  %v859_v54 = vpop.xlane.xlu0 %858 }
 0x4bb   :  { %v888_v55 = vsub.f32 %v786_v29, %v859_v54  ;;  %v890_v52 = vsub.f32 %v2300_v30, %v863_v53 }
 0x4bd   :  { %v906_v57 = vmul.f32 1.442695, %v888_v55  ;;  %v910_v63 = vmul.f32 1.442695, %v890_v52 }
 0x4be   :  { %v867_v59 = vpop.xlane.xlu1 %866  ;;  %v865_v51 = vpop.xlane.xlu0 %864 }
 0x4bf   :  { %v891_v60 = vsub.f32 %v801_v35, %v865_v51  ;;  %1912 = vpow2.f32 %v906_v57  ;;  %v892_v3 = vsub.f32 %v2303_v36, %v867_v59 }
 0x4c1   :  { %v912_v61 = vmul.f32 1.442695, %v891_v60 }
 0x4c2   :  { %v2340_v56 = vpop.eup %1908  ;;  %v871_v0 = vpop.xlane.xlu1 %870 }
 0x4c3   :  { %v869_v27 = vpop.xlane.xlu0 %868  ;;  %936 = vadd.xlane.f32.xlu0 %v2340_v56  ;;  %1914 = vpow2.f32 %v912_v61  ;;  %v894_v4 = vsub.f32 %v2308_v42, %v871_v0 }
 0x4c4   :  { %v2343_v58 = vpop.eup %1910  ;;  %1916 = vpow2.f32 %v910_v63 }
 0x4c5   :  { %934 = vadd.xlane.f32.xlu1 %v2343_v58  ;;  %1918 = vpow2.f32 %v908_v46  ;;  %v918_v9 = vmul.f32 1.442695, %v894_v4 }
 0x4c6   :  { %v875_v28 = vpop.xlane.xlu1 %874 }
 0x4c7   :  { %v873_v29 = vpop.xlane.xlu0 %872 }
 0x4c8   :  { %v895_v36 = vsub.f32 %v2312_v48, %v873_v29 }
 0x4ca   :  { %v879_v31 = vpop.xlane.xlu1 %878  ;;  %v920_v42 = vmul.f32 1.442695, %v895_v36 }
 0x4cb   :  { %v877_v32 = vpop.xlane.xlu0 %876  ;;  %v898_v62 = vsub.f32 %v2320_v14, %v879_v31 }
 0x4cc   :  { %v2346_v30 = vpop.eup %1912 }
 0x4cd   :  { %938 = vadd.xlane.f32.xlu0 %v2346_v30  ;;  %v926_v16 = vmul.f32 1.442695, %v898_v62 }
 0x4ce   :  { %v883_v33 = vpop.xlane.xlu1 %882 }
 0x4cf   :  { %v881_v34 = vpop.xlane.xlu0 %880 }
 0x4d0   :  { %v2349_v35 = vpop.eup %1914 }
 0x4d1   :  { %944 = vadd.xlane.f32.xlu0 %v2349_v35  ;;  %v2353_v40 = vpop.eup %1916 }
 0x4d2   :  { %v571_v37 = vpop.permute.xlu1 %570  ;;  %v2369_v18 = vpop.eup %1918 }
 0x4d3   :  { %v885_v38 = vpop.xlane.xlu0 %884  ;;  %v615_v39 = vmul.f32 %v571_v37, %v2227_v47  ;;  %v914_v47 = vmul.f32 1.442695, %v892_v3 }
 0x4d4   :  { %v901_v19 = vsub.f32 %v2330_v8, %v885_v38 }
 0x4d5   :  { %1791 = vmatprep.subr.mxu0 %v615_v39  ;;  %942 = vadd.xlane.f32.xlu0 %v2353_v40  ;;  %1920 = vpow2.f32 %v914_v47 }
 0x4d6   :  { %1792 = vmatpush3.msra.mxu0 %v615_v39  ;;  %566 = vrot.lane.b32.xlu1 %v2099_v49, %s2050_s1  ;;  %v896_v49 = vsub.f32 %v2314_v1, %v875_v28  ;;  %1922 = vpow2.f32 %v918_v9  ;;  %v897_v1 = vsub.f32 %v2318_v11, %v877_v32  ;;  %v932_v6 = vmul.f32 1.442695, %v901_v19 }
 0x4d7   :  { %v569_v43 = vpop.permute.xlu0 %568 }
 0x4d8   :  { %v614_v44 = vmul.f32 %v569_v43, %v2232_v2  ;;  %v893_v2 = vsub.f32 %v2306_v41, %v869_v27  ;;  %v922_v10 = vmul.f32 1.442695, %v896_v49  ;;  %v924_v48 = vmul.f32 1.442695, %v897_v1 }
 0x4da   :  { %1793 = vmatprep.subr.mxu0 %v614_v44  ;;  %v916_v15 = vmul.f32 1.442695, %v893_v2  ;;  %1924 = vpow2.f32 %v922_v10 }
 0x4db   :  { %1794 = vmatpush3.msra.mxu0 %v614_v44 }
 0x4dc   :  { %1926 = vpow2.f32 %v916_v15 }
 0x4dd   :  { %1928 = vpow2.f32 %v926_v16 }
 0x4de   :  { %1930 = vpow2.f32 %v920_v42 }
 0x4e2   :  { %v2374_v14 = vpop.eup %1920 }
 0x4e3   :  { %v2378_v23 = vpop.eup %1922 }
 0x4e7   :  { %v2381_v13 = vpop.eup %1924 }
 0x4e9   :  { %v2384_v8 = vpop.eup %1926 }
 0x4ea   :  { %v2386_v17 = vpop.eup %1928 }
 0x4eb   :  { %564 = vrot.lane.b32.xlu0 %v2101_v50, %s2050_s1  ;;  %v900_v50 = vsub.f32 %v2326_v22, %v883_v33  ;;  %v899_v22 = vsub.f32 %v2324_v20, %v881_v34  ;;  %v2390_v20 = vpop.eup %1930 }
 0x4ed   :  { %v930_v41 = vmul.f32 1.442695, %v900_v50  ;;  %v928_v11 = vmul.f32 1.442695, %v899_v22 }
 0x4ef   :  { %1932 = vpow2.f32 %v930_v41 }
 0x4f0   :  { %1934 = vpow2.f32 %v924_v48 }
 0x4f1   :  { %1936 = vpow2.f32 %v932_v6  ;;  %v2051_v6 = vmov 0.0  }
 0x4f2   :  { %1938 = vpow2.f32 %v928_v11 }
 0x4fa   :  { %940 = vadd.xlane.f32.xlu1 %v2369_v18 }
 0x4fc   :  { %v2392_v21 = vpop.eup %1932 }
 0x4fd   :  { %v2396_v24 = vpop.eup %1934 }
 0x4fe   :  { %946 = vadd.xlane.f32.xlu1 %v2374_v14  ;;  %v2398_v25 = vpop.eup %1936 }
 0x4ff   :  { %v2402_v26 = vpop.eup %1938 }
 0x502   :  { %950 = vadd.xlane.f32.xlu1 %v2378_v23 }
 0x506   :  { %954 = vadd.xlane.f32.xlu1 %v2381_v13 }
 0x50a   :  { %958 = vadd.xlane.f32.xlu1 %v2386_v17  ;;  %948 = vadd.xlane.f32.xlu0 %v2384_v8 }
 0x50e   :  { %962 = vadd.xlane.f32.xlu1 %v2392_v21  ;;  %952 = vadd.xlane.f32.xlu0 %v2390_v20 }
 0x512   :  { %956 = vadd.xlane.f32.xlu0 %v2396_v24  ;;  %964 = vadd.xlane.f32.xlu1 %v2398_v25 }
 0x516   :  { %960 = vadd.xlane.f32.xlu0 %v2402_v26 }
 0x54c   :  { %v937_v55 = vpop.xlane.xlu0 %936 }
 0x54e   :  { %v935_v53 = vpop.xlane.xlu1 %934 }
 0x54f   :  { %1940 = vrcp.f32 %v935_v53 }
 0x550   :  { %1942 = vrcp.f32 %v937_v55 }
 0x552   :  { %v567_v54 = vpop.permute.xlu1 %566 }
 0x553   :  { %v613_v57 = vmul.f32 %v567_v54, %v2237_v5 }
 0x555   :  { %1795 = vmatprep.subr.mxu0 %v613_v57 }
 0x556   :  { %1796 = vmatpush3.msra.mxu0 %v613_v57  ;;  %v939_v59 = vpop.xlane.xlu0 %938 }
 0x557   :  { %1944 = vrcp.f32 %v939_v59 }
 0x55a   :  { %v945_v51 = vpop.xlane.xlu0 %944 }
 0x55c   :  { %v1941_v60 = vpop.eup %1940 }
 0x55d   :  { %v967_v52 = vmul.f32 %v1941_v60, %v2343_v58  ;;  %v1943_v0 = vpop.eup %1942  ;;  %v107_v60 = vld [vmem:[#allocation5 + $0x208] sm:$0xf] }
 0x55e   :  { %v943_v61 = vpop.xlane.xlu0 %942  ;;  %v969_v29 = vmul.f32 %v1943_v0, %v2340_v56  ;;  %v47_v0 = vld [vmem:[#allocation5 + $0x28] sm:$0xff] }
 0x55f   :  { %1799 = vmatprep.mubr.f32.mxu0 %v967_v52  ;;  %1946 = vrcp.f32 %v943_v61  ;;  %v49_v52 = vld [vmem:[#allocation5 + $0x38] sm:$0xff]  ;;  %v48_v61 = vld [vmem:[#allocation5 + $0x30] sm:$0xff] }
 0x562   :  { %v565_v27 = vpop.permute.xlu0 %564 }
 0x563   :  { %v612_v63 = vmul.f32 %v565_v27, %v2242_v12  ;;  %v46_v27 = vld [vmem:[#allocation5 + $0x20] sm:$0xff] }
 0x564   :  { %v1945_v28 = vpop.eup %1944 }
 0x565   :  { %1797 = vmatprep.subr.mxu0 %v612_v63  ;;  %v971_v5 = vmul.f32 %v1945_v28, %v2346_v30 }
 0x566   :  { %1798 = vmatpush3.msra.mxu0 %v612_v63 }
 0x567   :  { %1800 = vmatmul.mubr.f32.vlgmr.msra.gmra.mxu0 %v969_v29  ;;  %1823 = vmatprep.subr.mxu0 %v2051_v6  ;;  %v1215_v29 = vsub.s32 2, %v2077_v7 }
 0x568   :  { %1802 = vmatprep.mubr.f32.mxu0 %v971_v5  ;;  %v2452_v5 = vld [vmem:[#allocation5 + $0x80] sm:$0xff] }
 0x56c   :  { %v1947_v34 = vpop.eup %1946 }
 0x56d   :  { %v975_v56 = vmul.f32 %v1947_v34, %v2353_v40 }
 0x583   :  { %v941_v31 = vpop.xlane.xlu1 %940 }
 0x584   :  { %1948 = vrcp.f32 %v941_v31  ;;  %v1216_v31 = vrot.slane %v2452_v5, %v1215_v29 }
 0x585   :  { %1950 = vrcp.f32 %v945_v51 }
 0x587   :  { %v947_v58 = vpop.xlane.xlu1 %946 }
 0x588   :  { %1952 = vrcp.f32 %v947_v58 }
 0x58b   :  { %v951_v32 = vpop.xlane.xlu1 %950 }
 0x58c   :  { %1954 = vrcp.f32 %v951_v32 }
 0x58f   :  { %v955_v33 = vpop.xlane.xlu1 %954 }
 0x591   :  { %v1949_v37 = vpop.eup %1948 }
 0x592   :  { %v973_v12 = vmul.f32 %v1949_v37, %v2369_v18  ;;  %v1951_v38 = vpop.eup %1950 }
 0x593   :  { %v949_v39 = vpop.xlane.xlu0 %948  ;;  %v959_v30 = vpop.xlane.xlu1 %958  ;;  %v977_v44 = vmul.f32 %v1951_v38, %v2349_v35 }
 0x594   :  { %1803 = vmatmul.mubr.f32.gmra.mxu0 %v973_v12  ;;  %1956 = vrcp.f32 %v949_v39 }
 0x595   :  { %v1953_v43 = vpop.eup %1952  ;;  %1805 = vmatprep.mubr.f32.mxu0 %v975_v56  ;;  %1958 = vrcp.f32 %v955_v33 }
 0x596   :  { %v979_v45 = vmul.f32 %v1953_v43, %v2374_v14  ;;  %v52_v43 = vld [vmem:[#allocation5 + $0x50] sm:$0xff] }
 0x597   :  { %v953_v46 = vpop.xlane.xlu0 %952  ;;  %v963_v3 = vpop.xlane.xlu1 %962 }
 0x598   :  { %1806 = vmatmul.mubr.f32.gmra.mxu0 %v977_v44  ;;  %1960 = vrcp.f32 %v953_v46  ;;  %v51_v44 = vld [vmem:[#allocation5 + $0x48] sm:$0xff] }
 0x599   :  { %1808 = vmatprep.mubr.f32.mxu0 %v979_v45  ;;  %1962 = vrcp.f32 %v959_v30  ;;  %v1955_v9 = vpop.eup %1954  ;;  %v53_v30 = vld [vmem:[#allocation5 + $0x58] sm:$0xff]  ;;  %v50_v45 = vld [vmem:[#allocation5 + $0x40] sm:$0xff] }
 0x59a   :  { %v983_v2 = vmul.f32 %v1955_v9, %v2378_v23 }
 0x59b   :  { %v957_v47 = vpop.xlane.xlu0 %956  ;;  %v965_v4 = vpop.xlane.xlu1 %964 }
 0x59c   :  { %1964 = vrcp.f32 %v957_v47 }
 0x59d   :  { %1966 = vrcp.f32 %v963_v3 }
 0x59f   :  { %v961_v40 = vpop.xlane.xlu0 %960 }
 0x5a0   :  { %1968 = vrcp.f32 %v961_v40  ;;  %v1307_v40 = vsub.s32 3, %v2077_v7 }
 0x5a1   :  { %v1957_v49 = vpop.eup %1956  ;;  %1970 = vrcp.f32 %v965_v4  ;;  %v1312_v4 = vsub.s32 4, %v2077_v7 }
 0x5a2   :  { %v981_v35 = vmul.f32 %v1957_v49, %v2384_v8  ;;  %v1959_v10 = vpop.eup %1958  ;;  %v1308_v9 = vrot.slane %v2452_v5, %v1307_v40 }
 0x5a3   :  { %v987_v36 = vmul.f32 %v1959_v10, %v2381_v13 }
 0x5a4   :  { %1809 = vmatmul.mubr.f32.gmra.mxu0 %v981_v35 }
 0x5a5   :  { %v1961_v62 = vpop.eup %1960  ;;  %1811 = vmatprep.mubr.f32.mxu0 %v983_v2  ;;  %v1313_v2 = vrot.slane %v2452_v5, %v1312_v4 }
 0x5a6   :  { %v985_v15 = vmul.f32 %v1961_v62, %v2390_v20  ;;  %v1963_v16 = vpop.eup %1962 }
 0x5a7   :  { %v991_v1 = vmul.f32 %v1963_v16, %v2386_v17  ;;  %v55_v16 = vld [vmem:[#allocation5 + $0x68] sm:$0xff] }
 0x5a8   :  { %1812 = vmatmul.mubr.f32.gmra.mxu0 %v985_v15  ;;  %v57_v15 = vld [vmem:[#allocation5 + $0x78] sm:$0xff] }
 0x5a9   :  { %v1965_v50 = vpop.eup %1964  ;;  %1814 = vmatprep.mubr.f32.mxu0 %v987_v36  ;;  %v56_v36 = vld [vmem:[#allocation5 + $0x70] sm:$0xff] }
 0x5aa   :  { %v989_v18 = vmul.f32 %v1965_v50, %v2396_v24  ;;  %v1967_v42 = vpop.eup %1966  ;;  %v54_v50 = vld [vmem:[#allocation5 + $0x60] sm:$0xff] }
 0x5ab   :  { %v995_v48 = vmul.f32 %v1967_v42, %v2392_v21 }
 0x5ac   :  { %1815 = vmatmul.mubr.f32.gmra.mxu0 %v989_v18  ;;  %v1317_v18 = vsub.s32 5, %v2077_v7 }
 0x5ad   :  { %v1969_v41 = vpop.eup %1968  ;;  %1817 = vmatprep.mubr.f32.mxu0 %v991_v1 }
 0x5ae   :  { %v993_v19 = vmul.f32 %v1969_v41, %v2402_v26  ;;  %v1971_v14 = vpop.eup %1970  ;;  %v1318_v42 = vrot.slane %v2452_v5, %v1317_v18 }
 0x5af   :  { %v997_v22 = vmul.f32 %v1971_v14, %v2398_v25 }
 0x5b0   :  { %1818 = vmatmul.mubr.f32.gmra.mxu0 %v993_v19 }
 0x5b1   :  { %1820 = vmatprep.mubr.f32.mxu0 %v995_v48 }
 0x5b4   :  { %1821 = vmatmul.mubr.f32.gmra.mxu0 %v997_v22 }
 0x5b5   :  { %1855 = vmatprep.mubr.msk.f32.mxu0 %vm2052_vm2, %v2051_v6 }
 0x627   :  { %v1801_v23 = vpop.f32.mrf.mxu0 }
 0x629   :  { %v1064_v11 = vpop.f32.mrf.mxu0 }
 0x654   :  { %v1804_v13 = vpop.f32.mrf.mxu0 }
 0x656   :  { %v1074_v8 = vpop.f32.mrf.mxu0 }
 0x658   :  { %v1807_v17 = vpop.f32.mrf.mxu0 }
 0x65a   :  { %v1084_v20 = vpop.f32.mrf.mxu0 }
 0x664   :  { %v1810_v24 = vpop.f32.mrf.mxu0 }
 0x666   :  { %v1094_v21 = vpop.f32.mrf.mxu0 }
 0x668   :  { %v1813_v26 = vpop.f32.mrf.mxu0 }
 0x66a   :  { %v1104_v53 = vpop.f32.mrf.mxu0 }
 0x66c   :  { %v1816_v54 = vpop.f32.mrf.mxu0 }
 0x66e   :  { %v1114_v25 = vpop.f32.mrf.mxu0 }
 0x670   :  { %v1819_v55 = vpop.f32.mrf.mxu0 }
 0x672   :  { %v1124_v57 = vpop.f32.mrf.mxu0 }
 0x674   :  { %v1822_v59 = vpop.f32.mrf.mxu0 }
 0x675   :  { %1824 = vmatpush3.msra.mxu0 %v1822_v59 }
 0x676   :  { %v1134_v51 = vpop.f32.mrf.mxu0  ;;  %1825 = vmatprep.subr.mxu0 %v2051_v6 }
 0x677   :  { %1826 = vmatpush3.msra.mxu0 %v1134_v51 }
 0x678   :  { %1827 = vmatprep.subr.mxu0 %v2051_v6 }
 0x679   :  { %1828 = vmatpush3.msra.mxu0 %v1819_v55 }
 0x67a   :  { %1829 = vmatprep.subr.mxu0 %v2051_v6 }
 0x67b   :  { %1830 = vmatpush3.msra.mxu0 %v1124_v57 }
 0x67c   :  { %1831 = vmatprep.subr.mxu0 %v2051_v6 }
 0x67d   :  { %1832 = vmatpush3.msra.mxu0 %v1816_v54 }
 0x67e   :  { %1833 = vmatprep.subr.mxu0 %v2051_v6 }
 0x67f   :  { %1834 = vmatpush3.msra.mxu0 %v1114_v25 }
 0x680   :  { %1835 = vmatprep.subr.mxu0 %v2051_v6 }
 0x681   :  { %1836 = vmatpush3.msra.mxu0 %v1813_v26 }
 0x682   :  { %1837 = vmatprep.subr.mxu0 %v2051_v6 }
 0x683   :  { %1838 = vmatpush3.msra.mxu0 %v1104_v53 }
 0x684   :  { %1839 = vmatprep.subr.mxu0 %v2051_v6 }
 0x685   :  { %1840 = vmatpush3.msra.mxu0 %v1810_v24 }
 0x686   :  { %1841 = vmatprep.subr.mxu0 %v2051_v6 }
 0x687   :  { %1842 = vmatpush3.msra.mxu0 %v1094_v21 }
 0x688   :  { %1843 = vmatprep.subr.mxu0 %v2051_v6 }
 0x689   :  { %1844 = vmatpush3.msra.mxu0 %v1807_v17 }
 0x68a   :  { %1845 = vmatprep.subr.mxu0 %v2051_v6 }
 0x68b   :  { %1846 = vmatpush3.msra.mxu0 %v1084_v20 }
 0x68c   :  { %1847 = vmatprep.subr.mxu0 %v2051_v6 }
 0x68d   :  { %1848 = vmatpush3.msra.mxu0 %v1804_v13 }
 0x68e   :  { %1849 = vmatprep.subr.mxu0 %v2051_v6 }
 0x68f   :  { %1850 = vmatpush3.msra.mxu0 %v1074_v8 }
 0x690   :  { %1851 = vmatprep.subr.mxu0 %v2051_v6 }
 0x691   :  { %1852 = vmatpush3.msra.mxu0 %v1801_v23 }
 0x692   :  { %1853 = vmatprep.subr.mxu0 %v2051_v6 }
 0x693   :  { %1854 = vmatpush3.msra.mxu0 %v1064_v11 }
 0x694   :  { %1856 = vmatmul.mubr.f32.vlgmr.msra.gmra.mxu0 %v107_v60  ;;  %1858 = vmatprep.subr.mxu0 %v2051_v6 }
 0x695   :  { %1859 = vmatpush3.msra.mxu0 %v49_v52  ;;  %1866 = vmatprep.mubr.msk.f32.mxu0 %vm2052_vm2, %v2051_v6 }
 0x696   :  { %1860 = vmatprep.subr.mxu0 %v2051_v6 }
 0x697   :  { %1861 = vmatpush3.msra.mxu0 %v48_v61 }
 0x698   :  { %1862 = vmatprep.subr.mxu0 %v2051_v6 }
 0x699   :  { %1863 = vmatpush3.msra.mxu0 %v47_v0 }
 0x69a   :  { %1864 = vmatprep.subr.mxu0 %v2051_v6 }
 0x69b   :  { %1865 = vmatpush3.msra.mxu0 %v46_v27 }
 0x69c   :  { %1869 = vmatprep.subr.mxu0 %v2051_v6 }
 0x754   :  { %v1209_v63 = vpop.f32.mrf.mxu0 }
 0x755   :  { %1867 = vmatmul.mubr.msk.f32.vlgmr.msra.gmra.mxu0 %vm628_vm1, %v1209_v63 }
 0x756   :  { %v1857_v28 = vpop.f32.mrf.mxu0  ;;  %1877 = vmatprep.mubr.msk.f32.mxu0 %vm2052_vm2, %v2051_v6  ;;  %1870 = vmatpush3.msra.mxu0 %v53_v30 }
 0x757   :  { %1871 = vmatprep.subr.mxu0 %v2051_v6 }
 0x758   :  { %1872 = vmatpush3.msra.mxu0 %v52_v43 }
 0x759   :  { %1873 = vmatprep.subr.mxu0 %v2051_v6 }
 0x75a   :  { %1874 = vmatpush3.msra.mxu0 %v51_v44 }
 0x75b   :  { %1875 = vmatprep.subr.mxu0 %v2051_v6 }
 0x75c   :  { %1876 = vmatpush3.msra.mxu0 %v50_v45 }
 0x75d   :  { %1880 = vmatprep.subr.mxu0 %v2051_v6 }
 0x815   :  { %v1286_v58 = vpop.f32.mrf.mxu0 }
 0x816   :  { %v1287_v32 = vadd.f32 %v1286_v58, %v1216_v31 }
 0x817   :  { %v1868_v33 = vpop.f32.mrf.mxu0 }
 0x818   :  { %v1291_v34 = vsel %vm1290_vm3, %v1287_v32, 0.0 }
 0x819   :  { %1292 = vadd.xlane.f32.xlu1 %v1291_v34 }
 0x8a2   :  { %v1293_v37 = vpop.xlane.xlu1 %1292 }
 0x8a3   :  { %v1295_v12 = vmul.f32 0.03125, %v1293_v37 }
 0x8a5   :  { %v1296_v38 = vsub.f32 %v1287_v32, %v1295_v12 }
 0x8a7   :  { %v1297_v39 = vmul.f32 %v1296_v38, %v1296_v38 }
 0x8a9   :  { %v1298_v56 = vsel %vm1290_vm3, %v1297_v39, 0.0 }
 0x8aa   :  { %1299 = vadd.xlane.f32.xlu1 %v1298_v56 }
 0x933   :  { %v1300_v46 = vpop.xlane.xlu1 %1299 }
 0x934   :  { %v1301_v3 = vmul.f32 0.03125, %v1300_v46 }
 0x936   :  { %v1302_v47 = vadd.f32 1e-05, %v1301_v3 }
 0x938   :  { %1972 = vrsqrt.f32 %v1302_v47 }
 0x945   :  { %v1973_v49 = vpop.eup %1972 }
 0x946   :  { %v1304_v35 = vmul.f32 %v1973_v49, %v1296_v38 }
 0x948   :  { %v1309_v10 = vmul.f32 %v1308_v9, %v1304_v35 }
 0x94a   :  { %v1314_v62 = vadd.f32 %v1313_v2, %v1309_v10 }
 0x94c   :  { %1878 = vmatmul.mubr.msk.f32.vlgmr.msra.gmra.mxu0 %vm628_vm1, %v1314_v62 }
 0x94d   :  { %1888 = vmatprep.mubr.msk.f32.mxu0 %vm2052_vm2, %v2051_v6  ;;  %1881 = vmatpush3.msra.mxu0 %v57_v15 }
 0x94e   :  { %1882 = vmatprep.subr.mxu0 %v2051_v6 }
 0x94f   :  { %1883 = vmatpush3.msra.mxu0 %v56_v36 }
 0x950   :  { %1884 = vmatprep.subr.mxu0 %v2051_v6 }
 0x951   :  { %1885 = vmatpush3.msra.mxu0 %v55_v16 }
 0x952   :  { %1886 = vmatprep.subr.mxu0 %v2051_v6  ;;  %v1400_v6 = vsub.s32 6, %v2077_v7 }
 0x953   :  { %1887 = vmatpush3.msra.mxu0 %v54_v50 }
 0x954   :  { %v1401_v8 = vrot.slane %v2452_v5, %v1400_v6 }
 0xa0c   :  { %v1388_v1 = vpop.f32.mrf.mxu0 }
 0xa0d   :  { %v1389_v41 = vadd.f32 %v1388_v1, %v1318_v42 }
 0xa0e   :  { %v1879_v19 = vpop.f32.mrf.mxu0 }
 0xa0f   :  { %v1392_v14 = vsub.f32 0.0, %v1389_v41 }
 0xa11   :  { %v1393_v48 = vmul.f32 1.442695, %v1392_v14 }
 0xa13   :  { %1974 = vpow2.f32 %v1393_v48 }
 0xa20   :  { %v1975_v22 = vpop.eup %1974 }
 0xa21   :  { %v1395_v23 = vadd.f32 1.0, %v1975_v22 }
 0xa23   :  { %1976 = vrcp.f32 %v1395_v23 }
 0xa30   :  { %v1977_v11 = vpop.eup %1976 }
 0xa31   :  { %v1397_v13 = vmul.f32 %v1977_v11, %v1389_v41 }
 0xa33   :  { %1889 = vmatmul.mubr.msk.f32.vlgmr.msra.gmra.mxu0 %vm628_vm1, %v1397_v13 }
 0xaf3   :  { %v1471_v17 = vpop.f32.mrf.mxu0 }
 0xaf4   :  { %v1472_v20 = vadd.f32 %v1471_v17, %v1401_v8 }
 0xaf5   :  { %v1890_v24 = vpop.f32.mrf.mxu0 }
 0xaf6   :  { %1475 = vst.msk [vmem:[#allocation7] sm:$0xf] %vm1290_vm3, %v1472_v20 }
 0xaf7   :  { %2030 = shalt.err (!%p2027_p0)
}
 0xaf8   :  { %1485 = dma.vmem_to_hbm [thread:$0]  %s1483_s22, 64, %s2482_s2, [#allocation4]  }
 0xaf9   :  { %2043 = dma.done.wait [#allocation4], 64  }
 0xafa   :  { %2044 = vsyncadd [#allocation4], 4294967232 }
 0xafb   :  { %1489 = vsyncpa [#allocation3], 1 }
 0xafc   :  { %1490 = vsyncpa [#allocation6], 1 }
 0xafd   :  { %1491 = vsyncpa [#allocation4], 1 }

</bundles_post_ra>
